<compile_context>
chip_gen: v6e
topology: v6e:2x2x1
jax: 0.10.0
libtpu: 0.0.40
codegen_flags: <defaults>
</compile_context>

<pallas_src>
import jax
import jax.numpy as jnp
from jax.experimental import pallas as pl
from jax.experimental.pallas import tpu as pltpu


def _round_up(v, m):
    return (v + m - 1) // m * m


def _cdiv(a, b):
    return -(-a // b)


def _pad2(a, rows, cols):
    pr, pc = rows - a.shape[0], cols - a.shape[1]
    if pr or pc:
        a = jnp.pad(a, ((0, pr), (0, pc)))
    return a


def _tpu_caps():
    """Best-effort TPU-generation query with safe fallbacks."""
    kind = ""
    try:
        kind = jax.devices()[0].device_kind.lower()
    except Exception:
        pass
    is_v7 = "v7" in kind
    is_v5e = ("v5e" in kind) or ("v5 lite" in kind) or ("v5litepod" in kind)
    vmem_phys = None
    try:
        info = pltpu.get_tpu_info()
        vmem_phys = int(getattr(info, "vmem_capacity_bytes", 0)) or None
    except Exception:
        pass
    if vmem_phys is None:
        vmem_phys = (64 << 20) if is_v7 else (128 << 20)
    # Scoped-VMEM cap well below physical so internal scratch / double-buffers
    # fit: ~48 MiB on v7x, ~96 MiB on v5e/v6e.
    vmem_cap = max(min(int(vmem_phys * 0.75), vmem_phys - (16 << 20)), 16 << 20)
    num_tc = 2 if is_v7 else 1
    return {"kind": kind, "is_v7": is_v7, "is_v5e": is_v5e,
            "vmem_phys": int(vmem_phys), "vmem_cap": int(vmem_cap),
            "num_tc": num_tc}


def _vmem_estimate(tb, in_p, th, out_p, num_k, xb, wb, ob):
    n_wbuf = 1 if num_k == 1 else 2
    return (2 * tb * in_p * xb                          # x tile (double-buffered)
            + n_wbuf * (in_p * th + th * out_p) * wb    # W1 + W2 tiles
            + n_wbuf * th * 4 + out_p * 4               # b1 + b2 (f32)
            + 2 * tb * out_p * ob                       # out tile (double-buffered)
            + tb * out_p * 4                            # f32 accumulator scratch
            + tb * th * 4                               # f32 h intermediate
            + tb * th * wb)                             # h cast before 2nd matmul


def ffnn_kernel(x_ref, w1_ref, b1_ref, w2_ref, b2_ref, o_ref, acc_ref):
    k = pl.program_id(1)

    # Fold b2 into the accumulator on the first hidden tile (added exactly once).
    @pl.when(k == 0)
    def _():
        acc_ref[...] = jnp.broadcast_to(
            b2_ref[...].astype(jnp.float32), acc_ref.shape)

    # Layer 1 partial: relu(x @ W1[:, k-th tile] + b1[k-th tile]) in f32.
    h = jnp.dot(x_ref[...], w1_ref[...], preferred_element_type=jnp.float32)
    h = jnp.maximum(h + b1_ref[...].astype(jnp.float32), 0.0)

    # Layer 2 partial: accumulate h @ W2[k-th tile, :] into the f32 scratch.
    acc_ref[...] += jnp.dot(h.astype(w2_ref.dtype), w2_ref[...],
                            preferred_element_type=jnp.float32)

    @pl.when(k == pl.num_programs(1) - 1)
    def _():
        o_ref[...] = acc_ref[...].astype(o_ref.dtype)


def prepare_ffnn_params(w1, b1, w2, b2, *, hidden_tile=None, cast_to_bf16=False):
    """Pad static parameters once (out of the per-call hot path) and pick the
    hidden tiling. Zero padding is exact: padded input cols hit zero W1 rows;
    padded hidden cols have zero W1 col + zero b1 -> relu(0)=0 -> zero
    contribution through zero W2 rows."""
    in_dim, hidden = w1.shape
    hidden2, out_dim = w2.shape
    assert hidden2 == hidden, "w1/w2 hidden dims must match"

    if cast_to_bf16 and w1.dtype == jnp.float32:
        w1 = w1.astype(jnp.bfloat16)
        w2 = w2.astype(jnp.bfloat16)
    compute_dtype = w1.dtype
    wb = jnp.dtype(compute_dtype).itemsize

    lane = 128
    in_p = _round_up(in_dim, lane)
    out_p = _round_up(out_dim, lane)
    hid_p = _round_up(hidden, lane)

    caps = _tpu_caps()
    cap = caps["vmem_cap"]

    if hidden_tile is not None:
        th = min(_round_up(hidden_tile, lane), hid_p)
    else:
        # VMEM-aware single-shot heuristic: keep the whole hidden dim in one
        # reduction step whenever resident weights + activation tiles fit the
        # budget, so weights are fetched from HBM exactly once for the call.
        tb_assume = 256
        weight_bytes = (in_p * hid_p + hid_p * out_p) * wb
        resident = (weight_bytes
                    + tb_assume * hid_p * (4 + wb)               # f32 h + cast
                    + tb_assume * out_p * 4                      # f32 accumulator
                    + 2 * tb_assume * (in_p * wb + out_p * 4))   # x/out dbl-buf
        th = hid_p if resident <= int(cap * 0.85) else min(512, hid_p)

    hid_pp = _round_up(hid_p, th)
    num_k = hid_pp // th

    w1_p = _pad2(w1.reshape(in_dim, hidden), in_p, hid_pp)
    b1_p = _pad2(jnp.asarray(b1, jnp.float32).reshape(1, -1), 1, hid_pp)
    w2_p = _pad2(w2.reshape(hidden, out_dim), hid_pp, out_p)
    b2_p = _pad2(jnp.asarray(b2, jnp.float32).reshape(1, -1), 1, out_p)

    return {"w1": w1_p, "b1": b1_p, "w2": w2_p, "b2": b2_p,
            "in_dim": in_dim, "out_dim": out_dim, "hidden": hidden,
            "in_p": in_p, "out_p": out_p, "hid_p": hid_pp,
            "th": th, "num_k": num_k,
            "compute_dtype": compute_dtype, "caps": caps}


def ffnn_apply(params, x, *, batch_tile=None, out_dtype=None,
               vmem_limit_bytes=None):
    """Hot path: relu(x @ W1 + b1) @ W2 + b2 with pre-padded parameters."""
    B, in_dim = x.shape
    assert in_dim == params["in_dim"]
    out_dtype = out_dtype or x.dtype

    caps = params["caps"]
    compute_dtype = params["compute_dtype"]
    if x.dtype != compute_dtype:
        x = x.astype(compute_dtype)

    in_p, out_p, hid_p = params["in_p"], params["out_p"], params["hid_p"]
    th, num_k = params["th"], params["num_k"]
    out_dim = params["out_dim"]

    xb = jnp.dtype(compute_dtype).itemsize
    wb = xb
    ob = jnp.dtype(out_dtype).itemsize
    sub = 16 if compute_dtype == jnp.bfloat16 else 8
    cap = caps["vmem_cap"]

    # ---- batch tile --------------------------------------------------------
    if batch_tile is not None:
        tb = max(_round_up(batch_tile, sub), sub)
    else:
        if caps["is_v5e"]:
            tb_max = 256                 # 4x128 MXU: M=256 already saturates it
        else:
            tb_max = 512 if compute_dtype == jnp.bfloat16 else 256
        if caps["num_tc"] >= 2 and B > sub:
            # v7x megacore: guarantee >= 2 batch tiles so both TCs get work.
            tb_max = min(tb_max, _round_up(_cdiv(B, 2), sub))
        tb_max = max(tb_max, sub)
        # Even tiling: divide B into near-equal tiles instead of padding up.
        n_tiles = max(1, _cdiv(B, tb_max))
        tb = max(_round_up(_cdiv(B, n_tiles), sub), sub)
        # Shrink tb only if the VMEM estimate exceeds the cap (floor 256 for
        # bf16 on v6e/v7x per review; else one sublane group).
        tb_floor = 256 if (compute_dtype == jnp.bfloat16
                           and not caps["is_v5e"]) else sub
        tb_floor = min(tb_floor, tb)
        while (tb > tb_floor and
               _vmem_estimate(tb, in_p, th, out_p, num_k, xb, wb, ob) > cap):
            tb = max(_round_up(tb // 2, sub), tb_floor)

    B_p = _round_up(B, tb)
    num_b = B_p // tb

    # Blocks whose index never changes need no double-buffering.
    n_wbuf = 1 if num_k == 1 else 2
    w_buf = pl.Buffered(n_wbuf)

    if vmem_limit_bytes is None:
        est = _vmem_estimate(tb, in_p, th, out_p, num_k, xb, wb, ob)
        vmem_limit_bytes = int(min(max(est + est // 2, 16 << 20), cap))

    # Fast path: skip jnp.pad on x when already aligned.
    x_p = x if (B_p == B and in_p == in_dim) else _pad2(x, B_p, in_p)

    weight_bytes = (in_p * hid_p + hid_p * out_p) * wb
    cost = pl.CostEstimate(
        flops=2 * B_p * (in_p * hid_p + hid_p * out_p),
        transcendentals=0,
        bytes_accessed=(B_p * in_p * xb + B_p * out_p * ob
                        + weight_bytes * (1 if num_k == 1 else num_b)
                        + (hid_p + out_p) * 4))

    out_padded = pl.pallas_call(
        ffnn_kernel,
        out_shape=jax.ShapeDtypeStruct((B_p, out_p), out_dtype),
        grid=(num_b, num_k),
        in_specs=[
            pl.BlockSpec((tb, in_p), lambda i, k: (i, 0)),
            pl.BlockSpec((in_p, th), lambda i, k: (0, k), pipeline_mode=w_buf),
            pl.BlockSpec((1, th), lambda i, k: (0, k), pipeline_mode=w_buf),
            pl.BlockSpec((th, out_p), lambda i, k: (k, 0), pipeline_mode=w_buf),
            pl.BlockSpec((1, out_p), lambda i, k: (0, 0),
                         pipeline_mode=pl.Buffered(1)),
        ],
        out_specs=pl.BlockSpec((tb, out_p), lambda i, k: (i, 0)),
        scratch_shapes=[pltpu.VMEM((tb, out_p), jnp.float32)],
        compiler_params=pltpu.CompilerParams(
            dimension_semantics=("parallel", "arbitrary"),
            vmem_limit_bytes=vmem_limit_bytes),
        cost_estimate=cost,
    )(x_p, params["w1"], params["b1"], params["w2"], params["b2"])

    # Fast path: skip the slice when already aligned.
    if B_p == B and out_p == out_dim:
        return out_padded
    return out_padded[:B, :out_dim]


def ffnn_forward(x, w1, b1, w2, b2, *, batch_tile=None, hidden_tile=None,
                 out_dtype=None, cast_to_bf16=False, vmem_limit_bytes=None):
    """Convenience wrapper. For repeated calls with the same parameters, call
    prepare_ffnn_params() once and reuse the result with ffnn_apply()."""
    params = prepare_ffnn_params(w1, b1, w2, b2, hidden_tile=hidden_tile,
                                 cast_to_bf16=cast_to_bf16)
    return ffnn_apply(params, x, batch_tile=batch_tile, out_dtype=out_dtype,
                      vmem_limit_bytes=vmem_limit_bytes)


def ffnn_reference(x, w1, b1, w2, b2):
    f32 = jnp.float32
    h = jnp.maximum(
        jnp.dot(x.astype(f32), w1.astype(f32)) + b1.astype(f32).reshape(1, -1),
        0.0)
    h = h.astype(w2.dtype).astype(f32)  # mimic kernel's cast before matmul 2
    return jnp.dot(h, w2.astype(f32)) + b2.astype(f32).reshape(1, -1)


def init_linear_params(key, in_features, out_features, dtype=jnp.float32):
    """PyTorch nn.Linear-style uniform(+/- 1/sqrt(fan_in)) init; weight stored
    pre-transposed as [in_features, out_features]; bias kept in f32."""
    kw, kb = jax.random.split(key)
    bound = 1.0 / float(jnp.sqrt(jnp.asarray(in_features, jnp.float32)))
    w = jax.random.uniform(kw, (in_features, out_features), jnp.float32,
                           minval=-bound, maxval=bound).astype(dtype)
    b = jax.random.uniform(kb, (1, out_features), jnp.float32,
                           minval=-bound, maxval=bound)
    return w, b


if __name__ == "__main__":
    key = jax.random.PRNGKey(0)

    # --- Test 1: small f32 shapes matching FFNN(input_num, hidden, output) ---
    batch, input_num, hidden_size, output_num = 8, 32, 64, 16
    kx, k1, k2, key = jax.random.split(key, 4)
    x = jax.random.normal(kx, (batch, input_num), jnp.float32)
    w1, b1 = init_linear_params(k1, input_num, hidden_size)
    w2, b2 = init_linear_params(k2, hidden_size, output_num)

    out = jax.block_until_ready(ffnn_forward(x, w1, b1, w2, b2))
    ref = ffnn_reference(x, w1, b1, w2, b2)
    assert out.shape == (batch, output_num)
    assert jnp.allclose(out, ref, atol=2e-5, rtol=2e-5), "f32 mismatch vs reference"

    # --- Test 2: bf16, auto heuristics (single-shot hidden, weights resident) ---
    batch, input_num, hidden_size, output_num = 384, 200, 1300, 80
    kx, k1, k2, key = jax.random.split(key, 4)
    xb = jax.random.normal(kx, (batch, input_num), jnp.float32).astype(jnp.bfloat16)
    w1b, b1b = init_linear_params(k1, input_num, hidden_size, dtype=jnp.bfloat16)
    w2b, b2b = init_linear_params(k2, hidden_size, output_num, dtype=jnp.bfloat16)

    params_b = prepare_ffnn_params(w1b, b1b, w2b, b2b)   # padded once, reused
    out_auto = jax.block_until_ready(ffnn_apply(params_b, xb))
    refb = ffnn_reference(xb, w1b, b1b, w2b, b2b)
    assert out_auto.shape == (batch, output_num)
    assert jnp.allclose(out_auto.astype(jnp.float32), refb, atol=5e-2, rtol=5e-2), \
        "bf16 (auto tiling) mismatch vs reference"

    # --- Test 3: same bf16 params, forced tiled-hidden + tiled-batch path -----
    out_tiled = jax.block_until_ready(
        ffnn_forward(xb, w1b, b1b, w2b, b2b, batch_tile=128, hidden_tile=512))
    assert out_tiled.shape == (batch, output_num)
    assert jnp.allclose(out_tiled.astype(jnp.float32), refb, atol=5e-2, rtol=5e-2), \
        "bf16 (tiled reduction) mismatch vs reference"

    print("KERNEL_OK")
</pallas_src>

<mosaic_0001>
module attributes {stable_mosaic.version = 11 : i64} {
  func.func @ffnn_kernel(%arg0: i32, %arg1: i32, %arg2: memref<8x128xf32, #tpu.memory_space<vmem>>, %arg3: memref<128x128xf32, #tpu.memory_space<vmem>>, %arg4: memref<1x128xf32, #tpu.memory_space<vmem>>, %arg5: memref<128x128xf32, #tpu.memory_space<vmem>>, %arg6: memref<1x128xf32, #tpu.memory_space<vmem>>, %arg7: memref<8x128xf32, #tpu.memory_space<vmem>>, %arg8: memref<8x128xf32, #tpu.memory_space<vmem>>) attributes {dimension_semantics = [#tpu.dimension_semantics<parallel>, #tpu.dimension_semantics<arbitrary>], iteration_bounds = array<i64: 1, 1>, scalar_prefetch = 0 : i64, scratch_operands = 1 : i64, tpu.core_type = #tpu.core_type<tc>, window_params = [{transform_indices = @transform_0, window_bounds = array<i64: 8, 128>}, {pipeline_mode = #tpu.pipeline_mode<synchronous>, transform_indices = @transform_1, window_bounds = array<i64: 128, 128>}, {pipeline_mode = #tpu.pipeline_mode<synchronous>, transform_indices = @transform_2, window_bounds = array<i64: 1, 128>}, {pipeline_mode = #tpu.pipeline_mode<synchronous>, transform_indices = @transform_3, window_bounds = array<i64: 128, 128>}, {pipeline_mode = #tpu.pipeline_mode<synchronous>, transform_indices = @transform_4, window_bounds = array<i64: 1, 128>}, {transform_indices = @transform_5, window_bounds = array<i64: 8, 128>}]} {
    %c0_i32 = arith.constant 0 : i32
    %0 = arith.cmpi eq, %arg1, %c0_i32 : i32
    %1 = arith.extui %0 : i1 to i32
    %c0_i32_0 = arith.constant 0 : i32
    %2 = arith.cmpi ne, %1, %c0_i32_0 : i32
    scf.if %2 {
      %c0_16 = arith.constant 0 : index
      %c0_17 = arith.constant 0 : index
      %19 = vector.load %arg6[%c0_16, %c0_17] : memref<1x128xf32, #tpu.memory_space<vmem>>, vector<1x128xf32>
      %20 = vector.shape_cast %19 : vector<1x128xf32> to vector<1x128xf32>
      %21 = vector.broadcast %20 : vector<1x128xf32> to vector<8x128xf32>
      %c0_18 = arith.constant 0 : index
      %c0_19 = arith.constant 0 : index
      %22 = vector.load %arg8[%c0_18, %c0_19] : memref<8x128xf32, #tpu.memory_space<vmem>>, vector<8x128xf32>
      tpu.vector_store %arg8[%c0_18, %c0_19], %21 {strides = array<i32>} : memref<8x128xf32, #tpu.memory_space<vmem>>, vector<8x128xf32>,
    } else {
    }
    %c0 = arith.constant 0 : index
    %c0_1 = arith.constant 0 : index
    %3 = vector.load %arg2[%c0, %c0_1] : memref<8x128xf32, #tpu.memory_space<vmem>>, vector<8x128xf32>
    %c0_2 = arith.constant 0 : index
    %c0_3 = arith.constant 0 : index
    %4 = vector.load %arg3[%c0_2, %c0_3] : memref<128x128xf32, #tpu.memory_space<vmem>>, vector<128x128xf32>
    %cst = arith.constant dense<0.000000e+00> : vector<8x128xf32>
    %5 = tpu.matmul %3, %4, %cst {dimension_numbers = #tpu.dot_dimension_numbers<[1], [0], [0], [1], [0, 0, 1, 1], [], []>} : vector<8x128xf32>, vector<128x128xf32>, vector<8x128xf32> -> vector<8x128xf32>
    %c0_4 = arith.constant 0 : index
    %c0_5 = arith.constant 0 : index
    %6 = vector.load %arg4[%c0_4, %c0_5] : memref<1x128xf32, #tpu.memory_space<vmem>>, vector<1x128xf32>
    %7 = vector.broadcast %6 : vector<1x128xf32> to vector<8x128xf32>
    %8 = arith.addf %5, %7 : vector<8x128xf32>
    %cst_6 = arith.constant 0.000000e+00 : f32
    %9 = vector.broadcast %cst_6 : f32 to vector<8x128xf32>
    %10 = arith.maximumf %8, %9 : vector<8x128xf32>
    %c0_7 = arith.constant 0 : index
    %c0_8 = arith.constant 0 : index
    %11 = vector.load %arg8[%c0_7, %c0_8] : memref<8x128xf32, #tpu.memory_space<vmem>>, vector<8x128xf32>
    %c0_9 = arith.constant 0 : index
    %c0_10 = arith.constant 0 : index
    %12 = vector.load %arg5[%c0_9, %c0_10] : memref<128x128xf32, #tpu.memory_space<vmem>>, vector<128x128xf32>
    %cst_11 = arith.constant dense<0.000000e+00> : vector<8x128xf32>
    %13 = tpu.matmul %10, %12, %cst_11 {dimension_numbers = #tpu.dot_dimension_numbers<[1], [0], [0], [1], [0, 0, 1, 1], [], []>} : vector<8x128xf32>, vector<128x128xf32>, vector<8x128xf32> -> vector<8x128xf32>
    %14 = arith.addf %11, %13 : vector<8x128xf32>
    %c0_12 = arith.constant 0 : index
    %c0_13 = arith.constant 0 : index
    %15 = vector.load %arg8[%c0_12, %c0_13] : memref<8x128xf32, #tpu.memory_space<vmem>>, vector<8x128xf32>
    tpu.vector_store %arg8[%c0_12, %c0_13], %14 {strides = array<i32>} : memref<8x128xf32, #tpu.memory_space<vmem>>, vector<8x128xf32>,
    %c0_i32_14 = arith.constant 0 : i32
    %16 = arith.cmpi eq, %arg1, %c0_i32_14 : i32
    %17 = arith.extui %16 : i1 to i32
    %c0_i32_15 = arith.constant 0 : i32
    %18 = arith.cmpi ne, %17, %c0_i32_15 : i32
    scf.if %18 {
      %c0_16 = arith.constant 0 : index
      %c0_17 = arith.constant 0 : index
      %19 = vector.load %arg8[%c0_16, %c0_17] : memref<8x128xf32, #tpu.memory_space<vmem>>, vector<8x128xf32>
      %c0_18 = arith.constant 0 : index
      %c0_19 = arith.constant 0 : index
      %20 = vector.load %arg7[%c0_18, %c0_19] : memref<8x128xf32, #tpu.memory_space<vmem>>, vector<8x128xf32>
      tpu.vector_store %arg7[%c0_18, %c0_19], %19 {strides = array<i32>} : memref<8x128xf32, #tpu.memory_space<vmem>>, vector<8x128xf32>,
    } else {
    }
    return
  }
  func.func @transform_0(%arg0: i32, %arg1: i32) -> (i32, i32) {
    %c0_i32 = arith.constant 0 : i32
    %c0_i32_0 = arith.constant 0 : i32
    return %arg0, %c0_i32 : i32, i32
  }
  func.func @transform_1(%arg0: i32, %arg1: i32) -> (i32, i32) {
    %c0_i32 = arith.constant 0 : i32
    %c0_i32_0 = arith.constant 0 : i32
    return %c0_i32, %arg1 : i32, i32
  }
  func.func @transform_2(%arg0: i32, %arg1: i32) -> (i32, i32) {
    %c0_i32 = arith.constant 0 : i32
    %c0_i32_0 = arith.constant 0 : i32
    return %c0_i32, %arg1 : i32, i32
  }
  func.func @transform_3(%arg0: i32, %arg1: i32) -> (i32, i32) {
    %c0_i32 = arith.constant 0 : i32
    %c0_i32_0 = arith.constant 0 : i32
    return %arg1, %c0_i32 : i32, i32
  }
  func.func @transform_4(%arg0: i32, %arg1: i32) -> (i32, i32) {
    %c0_i32 = arith.constant 0 : i32
    %c0_i32_0 = arith.constant 0 : i32
    %c0_i32_1 = arith.constant 0 : i32
    return %c0_i32, %c0_i32_0 : i32, i32
  }
  func.func @transform_5(%arg0: i32, %arg1: i32) -> (i32, i32) {
    %c0_i32 = arith.constant 0 : i32
    %c0_i32_0 = arith.constant 0 : i32
    return %arg0, %c0_i32 : i32, i32
  }
}

</mosaic_0001>

<bundles_post_ra>
// kernel: tpu_custom_call.1
= control target key start
LH: loop header
LB: loop body
LE: loop exit
PB: predicated region body
PF: predicated region fallthrough
CT: control target
= control target key end

     0   :  { %10 = vsyncpa [#allocation4], 0  ;;  %s567_s0 = inlined_call_operand.hbm [shape: f32[8,128], index: 0, kind: input, shape index: {}]   ;;  %s568_s1 = inlined_call_operand.hbm [shape: f32[128,128], index: 1, kind: input, shape index: {}]   ;;  %s569_s2 = inlined_call_operand.vmem [shape: f32[1,128], index: 2, kind: input, shape index: {}]   ;;  %s570_s3 = inlined_call_operand.hbm [shape: f32[128,128], index: 3, kind: input, shape index: {}]   ;;  %s571_s4 = inlined_call_operand.vmem [shape: f32[1,128], index: 4, kind: input, shape index: {}]   ;;  %s572_s5 = inlined_call_operand.hbm [shape: f32[8,128], index: 5, kind: output, shape index: {}]  }
   0x1   :  { %11 = vsyncpa [#allocation7], 0 }
   0x2   :  { %12 = vsyncpa [#allocation5], 0  ;;  %s477_s18 = smov [#allocation6]  }
   0x3   :  { %s28_s19 = sshll.u32 %s477_s18, 4  ;;  %s29_s19 = int_to_ptr.vmem [resolvable:$true] %s28_s19 }
   0x4   :  { %s399_s20 = scalar_lea.vmem %s29_s19, 2048  ;;  %p404_p1 = scmp.lt.s32.totalorder %s29_s19, %s29_s19 }
   0x5   :  { %p400_p0 = scmp.ne.s32.totalorder %s29_s19, %s399_s20  ;;  %p405_p2 = scmp.lt.s32.totalorder %s399_s20, %s399_s20 }
   0x7   :  { %p406_p3 = por %p405_p2, %p404_p1 }
   0x9   :  { %p407_p4 = pnand %p406_p3, %p400_p0 }
   0xb   :  { %410 = shalt.err (!%p407_p4)
}
   0xc   :  { %s478_s21 = smov 128   ;;  %s479_s22 = smov 8  }
   0xd   :  { %34 = dma.hbm_to_vmem [thread:$0]  %s568_s1, 2048, %s29_s19, [#allocation7], %s478_s21, %s478_s21, %s479_s22  }
   0xe   :  { %s480_s25 = smov [#allocation3]   ;;  %s481_s27 = smov [#allocation8]  }
   0xf   :  { %s19_s26 = sshll.u32 %s480_s25, 4  ;;  %s42_s28 = sshll.u32 %s481_s27, 4  ;;  %s20_s26 = int_to_ptr.vmem [resolvable:$true] %s19_s26  ;;  %s43_s28 = int_to_ptr.vmem [resolvable:$true] %s42_s28 }
  0x10   :  { %s419_s29 = scalar_lea.vmem %s20_s26, 128  ;;  %p424_p6 = scmp.lt.s32.totalorder %s20_s26, %s20_s26 }
  0x11   :  { %p420_p5 = scmp.ne.s32.totalorder %s20_s26, %s419_s29  ;;  %p425_p7 = scmp.lt.s32.totalorder %s419_s29, %s419_s29 }
  0x13   :  { %p426_p8 = por %p425_p7, %p424_p6 }
  0x15   :  { %p427_p9 = pnand %p426_p8, %p420_p5 }
  0x17   :  { %430 = shalt.err (!%p427_p9)
}
  0x18   :  { %22 = dma.hbm_to_vmem [thread:$0]  %s567_s0, 128, %s20_s26, [#allocation4]  }
  0x19   :  { %s439_s7 = scalar_lea.vmem %s43_s28, 2048  ;;  %p444_p11 = scmp.lt.s32.totalorder %s43_s28, %s43_s28 }
  0x1a   :  { %p440_p10 = scmp.ne.s32.totalorder %s43_s28, %s439_s7  ;;  %p445_p12 = scmp.lt.s32.totalorder %s439_s7, %s439_s7 }
  0x1c   :  { %p446_p13 = por %p445_p12, %p444_p11 }
  0x1e   :  { %p447_p0 = pnand %p446_p13, %p440_p10 }
  0x20   :  { %450 = shalt.err (!%p447_p0)
}
  0x21   :  { %48 = dma.hbm_to_vmem [thread:$0]  %s570_s3, 2048, %s43_s28, [#allocation7], %s478_s21, %s478_s21, %s479_s22  }
  0x22   :  { %471 = dma.done.wait [#allocation4], 128  }
  0x23   :  { %472 = vsyncadd [#allocation4], 4294967168 }
  0x24   :  { %473 = dma.done.wait [#allocation7], 4096  }
  0x25   :  { %474 = vsyncadd [#allocation7], 4294963200  ;;  %v482_v0 = vmov 0.0   ;;  %vm483_vm0 = vmmov 0   ;;  %v88_v1 = vld [vmem:[#allocation6 + $0x78] sm:$0xff]  ;;  %v87_v2 = vld [vmem:[#allocation6 + $0x70] sm:$0xff] }
  0x26   :  { %313 = vmatprep.subr.mxu0 %v482_v0  ;;  %345 = vmatprep.mubr.msk.f32.mxu0 %vm483_vm0, %v482_v0  ;;  %v86_v3 = vld [vmem:[#allocation6 + $0x68] sm:$0xff]  ;;  %v85_v4 = vld [vmem:[#allocation6 + $0x60] sm:$0xff]  ;;  %v183_v5 = vld [vmem:[#allocation8 + $0x78] sm:$0xff]  ;;  %s484_s11 = smov [#allocation9]  }
  0x27   :  { %348 = vmatprep.subr.mxu1 %v482_v0  ;;  %380 = vmatprep.mubr.msk.f32.mxu1 %vm483_vm0, %v482_v0  ;;  %v84_v6 = vld [vmem:[#allocation6 + $0x58] sm:$0xff]  ;;  %v182_v7 = vld [vmem:[#allocation8 + $0x70] sm:$0xff]  ;;  %v181_v8 = vld [vmem:[#allocation8 + $0x68] sm:$0xff]  ;;  %s267_s12 = sshll.u32 %s484_s11, 4  ;;  %s268_s12 = int_to_ptr.vmem [resolvable:$true] %s267_s12 }
  0x28   :  { %314 = vmatpush3.msra.mxu0 %v88_v1  ;;  %349 = vmatpush3.msra.mxu1 %v183_v5  ;;  %v83_v9 = vld [vmem:[#allocation6 + $0x50] sm:$0xff]  ;;  %v180_v10 = vld [vmem:[#allocation8 + $0x60] sm:$0xff]  ;;  %v82_v11 = vld [vmem:[#allocation6 + $0x48] sm:$0xff]  ;;  %s451_s13 = scalar_lea.vmem %s268_s12, 128  ;;  %p456_p2 = scmp.lt.s32.totalorder %s268_s12, %s268_s12 }
  0x29   :  { %315 = vmatprep.subr.mxu0 %v482_v0  ;;  %350 = vmatprep.subr.mxu1 %v482_v0  ;;  %v179_v12 = vld [vmem:[#allocation8 + $0x58] sm:$0xff]  ;;  %v81_v13 = vld [vmem:[#allocation6 + $0x40] sm:$0xff]  ;;  %v178_v14 = vld [vmem:[#allocation8 + $0x50] sm:$0xff]  ;;  %p452_p1 = scmp.ne.s32.totalorder %s268_s12, %s451_s13  ;;  %p457_p3 = scmp.lt.s32.totalorder %s451_s13, %s451_s13 }
  0x2a   :  { %316 = vmatpush3.msra.mxu0 %v87_v2  ;;  %351 = vmatpush3.msra.mxu1 %v182_v7  ;;  %v80_v15 = vld [vmem:[#allocation6 + $0x38] sm:$0xff]  ;;  %v177_v16 = vld [vmem:[#allocation8 + $0x48] sm:$0xff]  ;;  %v79_v17 = vld [vmem:[#allocation6 + $0x30] sm:$0xff] }
  0x2b   :  { %317 = vmatprep.subr.mxu0 %v482_v0  ;;  %352 = vmatprep.subr.mxu1 %v482_v0  ;;  %v176_v18 = vld [vmem:[#allocation8 + $0x40] sm:$0xff]  ;;  %v78_v19 = vld [vmem:[#allocation6 + $0x28] sm:$0xff]  ;;  %v175_v20 = vld [vmem:[#allocation8 + $0x38] sm:$0xff]  ;;  %p458_p4 = por %p457_p3, %p456_p2 }
  0x2c   :  { %318 = vmatpush3.msra.mxu0 %v86_v3  ;;  %353 = vmatpush3.msra.mxu1 %v181_v8  ;;  %v77_v21 = vld [vmem:[#allocation6 + $0x20] sm:$0xff]  ;;  %v174_v22 = vld [vmem:[#allocation8 + $0x30] sm:$0xff]  ;;  %v76_v23 = vld [vmem:[#allocation6 + $0x18] sm:$0xff] }
  0x2d   :  { %319 = vmatprep.subr.mxu0 %v482_v0  ;;  %354 = vmatprep.subr.mxu1 %v482_v0  ;;  %v173_v24 = vld [vmem:[#allocation8 + $0x28] sm:$0xff]  ;;  %v75_v25 = vld [vmem:[#allocation6 + $0x10] sm:$0xff]  ;;  %v172_v26 = vld [vmem:[#allocation8 + $0x20] sm:$0xff]  ;;  %p459_p5 = pnand %p458_p4, %p452_p1 }
  0x2e   :  { %320 = vmatpush3.msra.mxu0 %v85_v4  ;;  %355 = vmatpush3.msra.mxu1 %v180_v10  ;;  %v74_v27 = vld [vmem:[#allocation6 + $0x8] sm:$0xff]  ;;  %v171_v28 = vld [vmem:[#allocation8 + $0x18] sm:$0xff]  ;;  %v73_v29 = vld [vmem:[#allocation6] sm:$0xff] }
  0x2f   :  { %321 = vmatprep.subr.mxu0 %v482_v0  ;;  %356 = vmatprep.subr.mxu1 %v482_v0  ;;  %v72_v30 = vld [vmem:[#allocation3] sm:$0xff]  ;;  %v170_v31 = vld [vmem:[#allocation8 + $0x10] sm:$0xff]  ;;  %v169_v32 = vld [vmem:[#allocation8 + $0x8] sm:$0xff] }
  0x30   :  { %322 = vmatpush3.msra.mxu0 %v84_v6  ;;  %357 = vmatpush3.msra.mxu1 %v179_v12  ;;  %v168_v33 = vld [vmem:[#allocation8] sm:$0xff]  ;;  %v278_v34 = vld [vmem:[%s569_s2] ss:$0 sm:$0xff] }
  0x31   :  { %323 = vmatprep.subr.mxu0 %v482_v0  ;;  %358 = vmatprep.subr.mxu1 %v482_v0  ;;  %v277_v39 = vld [vmem:[%s571_s4] ss:$0 sm:$0xff] }
  0x32   :  { %324 = vmatpush3.msra.mxu0 %v83_v9  ;;  %359 = vmatpush3.msra.mxu1 %v178_v14 }
  0x33   :  { %325 = vmatprep.subr.mxu0 %v482_v0  ;;  %360 = vmatprep.subr.mxu1 %v482_v0 }
  0x34   :  { %326 = vmatpush3.msra.mxu0 %v82_v11  ;;  %361 = vmatpush3.msra.mxu1 %v177_v16 }
  0x35   :  { %327 = vmatprep.subr.mxu0 %v482_v0  ;;  %362 = vmatprep.subr.mxu1 %v482_v0 }
  0x36   :  { %328 = vmatpush3.msra.mxu0 %v81_v13  ;;  %363 = vmatpush3.msra.mxu1 %v176_v18 }
  0x37   :  { %329 = vmatprep.subr.mxu0 %v482_v0  ;;  %364 = vmatprep.subr.mxu1 %v482_v0 }
  0x38   :  { %330 = vmatpush3.msra.mxu0 %v80_v15  ;;  %365 = vmatpush3.msra.mxu1 %v175_v20 }
  0x39   :  { %331 = vmatprep.subr.mxu0 %v482_v0  ;;  %366 = vmatprep.subr.mxu1 %v482_v0 }
  0x3a   :  { %332 = vmatpush3.msra.mxu0 %v79_v17  ;;  %367 = vmatpush3.msra.mxu1 %v174_v22 }
  0x3b   :  { %333 = vmatprep.subr.mxu0 %v482_v0  ;;  %368 = vmatprep.subr.mxu1 %v482_v0 }
  0x3c   :  { %334 = vmatpush3.msra.mxu0 %v78_v19  ;;  %369 = vmatpush3.msra.mxu1 %v173_v24 }
  0x3d   :  { %335 = vmatprep.subr.mxu0 %v482_v0  ;;  %370 = vmatprep.subr.mxu1 %v482_v0 }
  0x3e   :  { %336 = vmatpush3.msra.mxu0 %v77_v21  ;;  %371 = vmatpush3.msra.mxu1 %v172_v26 }
  0x3f   :  { %337 = vmatprep.subr.mxu0 %v482_v0  ;;  %372 = vmatprep.subr.mxu1 %v482_v0 }
  0x40   :  { %338 = vmatpush3.msra.mxu0 %v76_v23  ;;  %373 = vmatpush3.msra.mxu1 %v171_v28 }
  0x41   :  { %339 = vmatprep.subr.mxu0 %v482_v0  ;;  %374 = vmatprep.subr.mxu1 %v482_v0 }
  0x42   :  { %340 = vmatpush3.msra.mxu0 %v75_v25  ;;  %375 = vmatpush3.msra.mxu1 %v170_v31 }
  0x43   :  { %341 = vmatprep.subr.mxu0 %v482_v0  ;;  %376 = vmatprep.subr.mxu1 %v482_v0 }
  0x44   :  { %342 = vmatpush3.msra.mxu0 %v74_v27  ;;  %377 = vmatpush3.msra.mxu1 %v169_v32 }
  0x45   :  { %343 = vmatprep.subr.mxu0 %v482_v0  ;;  %378 = vmatprep.subr.mxu1 %v482_v0 }
  0x46   :  { %344 = vmatpush3.msra.mxu0 %v73_v29  ;;  %379 = vmatpush3.msra.mxu1 %v168_v33 }
  0x47   :  { %346 = vmatmul.mubr.f32.vlgmr.msra.gmra.mxu0 %v72_v30 }
 0x107   :  { %v162_v35 = vpop.f32.mrf.mxu0 }
 0x108   :  { %v163_v36 = vadd.f32 %v278_v34, %v162_v35 }
 0x109   :  { %v347_v37 = vpop.f32.mrf.mxu0 }
 0x10a   :  { %v166_v38 = vmax.f32 %v163_v36, 0.0 }
 0x10c   :  { %381 = vmatmul.mubr.f32.vlgmr.msra.gmra.mxu1 %v166_v38 }
 0x1cc   :  { %v250_v40 = vpop.f32.mrf.mxu1 }
 0x1cd   :  { %v254_v41 = vadd.f32 %v277_v39, %v250_v40 }
 0x1ce   :  { %v382_v42 = vpop.f32.mrf.mxu1 }
 0x1cf   :  { %260 = vst [vmem:[#allocation9] sm:$0xff] %v254_v41 }
 0x1d0   :  { %462 = shalt.err (!%p459_p5)
}
 0x1d1   :  { %270 = dma.vmem_to_hbm [thread:$0]  %s268_s12, 128, %s572_s5, [#allocation5]  }
 0x1d2   :  { %475 = dma.done.wait [#allocation5], 128  }
 0x1d3   :  { %476 = vsyncadd [#allocation5], 4294967168 }
 0x1d4   :  { %274 = vsyncpa [#allocation4], 1 }
 0x1d5   :  { %275 = vsyncpa [#allocation7], 1 }
 0x1d6   :  { %276 = vsyncpa [#allocation5], 1 }

</bundles_post_ra>
